<compile_context>
chip_gen: v5e
topology: v5e:2x2
jax: 0.10.0
libtpu: 0.0.40
codegen_flags: <defaults>
</compile_context>

<pallas_src>
import jax
import jax.numpy as jnp
from jax.experimental import pallas as pl
from jax.experimental.pallas import tpu as pltpu

_LANE = 128            # vreg lane width; last dim of the data slab
_TILE_ROWS = 8192      # (8192, 128) f32 = 4 MiB/block; 3 streams x 2 bufs = 24 MiB VMEM
_TARGET_GRID_STEPS = 8 # always give the pipeline (and v7x's 2 TCs) several steps


def _round_up(x, m):
    return -(-x // m) * m


def _posterior_kernel(w_ref, x_ref, mean_ref, logvar_ref):
    # w_ref   : SMEM f32[8] = [wm_x, wm_ones, b_mean, wv_x2, wv_x, wv_ones, b_lv, 0]
    # x_ref   : VMEM f32[tr, 128]  (lane-dense slab of the flattened batch)
    # outputs : VMEM f32[tr, 128]
    x = x_ref[...]

    # Scalar-unit work: fold the constant ("ones") feature columns into the
    # biases once, before any vector expression.
    wm0 = w_ref[0]
    mean_const = w_ref[1] + w_ref[2]          # wm_ones * 1 + b_mean
    wv0 = w_ref[3]
    wv1 = w_ref[4]
    lv_const = w_ref[5] + w_ref[6]            # wv_ones * 1 + b_lv

    mean_ref[...] = x * wm0 + mean_const
    # Horner form: 2 vmul + 2 vadd per vreg instead of 3 vmul + 2 vadd.
    logvar_ref[...] = x * (x * wv0 + wv1) + lv_const


def student_predictive_posterior(x, mean_w, mean_b, lv_w, lv_b,
                                 *, tile_rows=_TILE_ROWS, min_pallas_n=65536):
    """x: [N, 1] f32.  mean_w: [1, 2], mean_b: [1], lv_w: [1, 3], lv_b: [1].

    Returns (mean [N, 1], log_variance [N, 1]), matching the PyTorch module.
    """
    n = x.shape[0]
    x = x.astype(jnp.float32)

    # Pack the 7 Linear scalars into a single f32[8] vector (one SMEM buffer).
    # Column order mirrors the PyTorch cat order: mean=[x, ones], lv=[x^2, x, ones].
    w = jnp.concatenate([
        mean_w.reshape(-1), mean_b.reshape(-1),
        lv_w.reshape(-1), lv_b.reshape(-1),
        jnp.zeros((1,), jnp.float32),
    ]).astype(jnp.float32)

    if n < min_pallas_n:
        # Small/medium batch: pallas_call fixed overhead + pad/slice copies
        # exceed the ~30 flops of work; the fused XLA expression is faster.
        wm0, mean_const = w[0], w[1] + w[2]
        wv0, wv1, lv_const = w[3], w[4], w[5] + w[6]
        mean = x * wm0 + mean_const
        log_variance = x * (x * wv0 + wv1) + lv_const
        return mean, log_variance

    # ---- Lane-dense repacking: [N, 1] -> [rows, 128] slab. -----------------
    # Only N is padded (to a multiple of 128).  When N % 128 == 0 this is a
    # pure reshape (zero copy) and the output reshape back is also zero copy.
    lane = _LANE
    rows = pl.cdiv(n, lane)
    padded_n = rows * lane

    x_flat = x.reshape(-1)
    if padded_n != n:
        x_flat = jnp.pad(x_flat, (0, padded_n - n))
    x2d = x_flat.reshape(rows, lane)

    # Tile rows: always several grid steps (pipeline overlap + v7x megacore),
    # rounded to a multiple of 8 (sublane rule), capped at tile_rows (VMEM).
    tr_cap = max(8, _round_up(int(tile_rows), 8))
    tr = min(tr_cap, max(8, _round_up(pl.cdiv(rows, _TARGET_GRID_STEPS), 8)))
    grid = (pl.cdiv(rows, tr),)   # ragged last block clipped/masked by Pallas

    data_spec = lambda: pl.BlockSpec((tr, lane), lambda i, w_sm: (i, 0))

    mean2d, logvar2d = pl.pallas_call(
        _posterior_kernel,
        out_shape=(
            jax.ShapeDtypeStruct((rows, lane), jnp.float32),
            jax.ShapeDtypeStruct((rows, lane), jnp.float32),
        ),
        grid_spec=pltpu.PrefetchScalarGridSpec(
            num_scalar_prefetch=1,            # w -> SMEM, passed first to kernel
            grid=grid,
            in_specs=[data_spec()],
            out_specs=(data_spec(), data_spec()),
        ),
        compiler_params=pltpu.CompilerParams(
            dimension_semantics=("parallel",),   # v7x: shard grid across 2 TCs
        ),
    )(w, x2d)

    # Restore the PyTorch [N, 1] output shape.  For N % 128 == 0 this is a
    # zero-copy reshape; otherwise slice off the padded tail lanes.
    if padded_n == n:
        mean = mean2d.reshape(n, 1)
        log_variance = logvar2d.reshape(n, 1)
    else:
        mean = mean2d.reshape(-1)[:n].reshape(n, 1)
        log_variance = logvar2d.reshape(-1)[:n].reshape(n, 1)
    return mean, log_variance


def _reference(x, mean_w, mean_b, lv_w, lv_b):
    x = x.astype(jnp.float32)
    mean_features = jnp.concatenate([x, jnp.ones_like(x)], axis=1)          # [N, 2]
    mean = mean_features @ mean_w.T + mean_b                                # [N, 1]
    lv_features = jnp.concatenate([x ** 2, x, jnp.ones_like(x)], axis=1)    # [N, 3]
    log_variance = lv_features @ lv_w.T + lv_b                              # [N, 1]
    return mean, log_variance


if __name__ == "__main__":
    key = jax.random.PRNGKey(0)
    k_x1, k_x2, k_x3, k_mw, k_mb, k_vw, k_vb = jax.random.split(key, 7)

    # Deterministic Linear params, PyTorch-style uniform(-1/sqrt(fan_in), 1/sqrt(fan_in)).
    bnd_mean = 1.0 / jnp.sqrt(2.0)
    mean_w = jax.random.uniform(k_mw, (1, 2), minval=-bnd_mean, maxval=bnd_mean,
                                dtype=jnp.float32)
    mean_b = jax.random.uniform(k_mb, (1,), minval=-bnd_mean, maxval=bnd_mean,
                                dtype=jnp.float32)
    bnd_lv = 1.0 / jnp.sqrt(3.0)
    lv_w = jax.random.uniform(k_vw, (1, 3), minval=-bnd_lv, maxval=bnd_lv,
                              dtype=jnp.float32)
    lv_b = jax.random.uniform(k_vb, (1,), minval=-bnd_lv, maxval=bnd_lv,
                              dtype=jnp.float32)

    # --- Pallas path, N % 128 == 0 (zero-copy repack) + ragged last block. --
    # N = 2560 -> rows = 20, tr = 8, grid = 3 (last block clipped by Pallas).
    N1 = 2560
    x1 = jax.random.normal(k_x1, (N1, 1), dtype=jnp.float32)
    m1, lv1 = student_predictive_posterior(x1, mean_w, mean_b, lv_w, lv_b,
                                           min_pallas_n=0)
    jax.block_until_ready(m1)
    jax.block_until_ready(lv1)
    r_m1, r_lv1 = _reference(x1, mean_w, mean_b, lv_w, lv_b)
    assert m1.shape == (N1, 1) and lv1.shape == (N1, 1)
    assert jnp.allclose(m1, r_m1, atol=1e-5, rtol=1e-5)
    assert jnp.allclose(lv1, r_lv1, atol=1e-5, rtol=1e-5)

    # --- Pallas path, N not a multiple of 128 (pad + slice-back). -----------
    N2 = 2000
    x2 = jax.random.normal(k_x2, (N2, 1), dtype=jnp.float32)
    m2, lv2 = student_predictive_posterior(x2, mean_w, mean_b, lv_w, lv_b,
                                           min_pallas_n=0)
    jax.block_until_ready(m2)
    r_m2, r_lv2 = _reference(x2, mean_w, mean_b, lv_w, lv_b)
    assert m2.shape == (N2, 1) and lv2.shape == (N2, 1)
    assert jnp.allclose(m2, r_m2, atol=1e-5, rtol=1e-5)
    assert jnp.allclose(lv2, r_lv2, atol=1e-5, rtol=1e-5)

    # --- Tiny-batch fast path (default cutoff, no Pallas launch). -----------
    N3 = 8
    x3 = jax.random.normal(k_x3, (N3, 1), dtype=jnp.float32)
    m3, lv3 = student_predictive_posterior(x3, mean_w, mean_b, lv_w, lv_b)
    jax.block_until_ready(m3)
    r_m3, r_lv3 = _reference(x3, mean_w, mean_b, lv_w, lv_b)
    assert m3.shape == (N3, 1) and lv3.shape == (N3, 1)
    assert jnp.allclose(m3, r_m3, atol=1e-5, rtol=1e-5)
    assert jnp.allclose(lv3, r_lv3, atol=1e-5, rtol=1e-5)

    print("KERNEL_OK")
</pallas_src>

<mosaic_0001>
module attributes {stable_mosaic.version = 11 : i64} {
  func.func @_posterior_kernel(%arg0: i32, %arg1: memref<8xf32, #tpu.memory_space<smem>>, %arg2: memref<8x128xf32, #tpu.memory_space<vmem>>, %arg3: memref<8x128xf32, #tpu.memory_space<vmem>>, %arg4: memref<8x128xf32, #tpu.memory_space<vmem>>) attributes {dimension_semantics = [#tpu.dimension_semantics<parallel>], iteration_bounds = array<i64: 3>, scalar_prefetch = 1 : i64, scratch_operands = 0 : i64, tpu.core_type = #tpu.core_type<tc>, window_params = [{transform_indices = @transform_0, window_bounds = array<i64: 8, 128>}, {transform_indices = @transform_1, window_bounds = array<i64: 8, 128>}, {transform_indices = @transform_2, window_bounds = array<i64: 8, 128>}]} {
    %c0 = arith.constant 0 : index
    %c0_0 = arith.constant 0 : index
    %0 = vector.load %arg2[%c0, %c0_0] : memref<8x128xf32, #tpu.memory_space<vmem>>, vector<8x128xf32>
    %c0_1 = arith.constant 0 : index
    %1 = memref.load %arg1[%c0_1] : memref<8xf32, #tpu.memory_space<smem>>
    %c1 = arith.constant 1 : index
    %2 = memref.load %arg1[%c1] : memref<8xf32, #tpu.memory_space<smem>>
    %c2 = arith.constant 2 : index
    %3 = memref.load %arg1[%c2] : memref<8xf32, #tpu.memory_space<smem>>
    %4 = arith.addf %2, %3 : f32
    %c3 = arith.constant 3 : index
    %5 = memref.load %arg1[%c3] : memref<8xf32, #tpu.memory_space<smem>>
    %c4 = arith.constant 4 : index
    %6 = memref.load %arg1[%c4] : memref<8xf32, #tpu.memory_space<smem>>
    %c5 = arith.constant 5 : index
    %7 = memref.load %arg1[%c5] : memref<8xf32, #tpu.memory_space<smem>>
    %c6 = arith.constant 6 : index
    %8 = memref.load %arg1[%c6] : memref<8xf32, #tpu.memory_space<smem>>
    %9 = arith.addf %7, %8 : f32
    %10 = vector.broadcast %1 : f32 to vector<8x128xf32>
    %11 = arith.mulf %0, %10 : vector<8x128xf32>
    %12 = vector.broadcast %4 : f32 to vector<8x128xf32>
    %13 = arith.addf %11, %12 : vector<8x128xf32>
    %c0_2 = arith.constant 0 : index
    %c0_3 = arith.constant 0 : index
    %14 = vector.load %arg3[%c0_2, %c0_3] : memref<8x128xf32, #tpu.memory_space<vmem>>, vector<8x128xf32>
    tpu.vector_store %arg3[%c0_2, %c0_3], %13 {strides = array<i32>} : memref<8x128xf32, #tpu.memory_space<vmem>>, vector<8x128xf32>,
    %15 = vector.broadcast %5 : f32 to vector<8x128xf32>
    %16 = arith.mulf %0, %15 : vector<8x128xf32>
    %17 = vector.broadcast %6 : f32 to vector<8x128xf32>
    %18 = arith.addf %16, %17 : vector<8x128xf32>
    %19 = arith.mulf %0, %18 : vector<8x128xf32>
    %20 = vector.broadcast %9 : f32 to vector<8x128xf32>
    %21 = arith.addf %19, %20 : vector<8x128xf32>
    %c0_4 = arith.constant 0 : index
    %c0_5 = arith.constant 0 : index
    %22 = vector.load %arg4[%c0_4, %c0_5] : memref<8x128xf32, #tpu.memory_space<vmem>>, vector<8x128xf32>
    tpu.vector_store %arg4[%c0_4, %c0_5], %21 {strides = array<i32>} : memref<8x128xf32, #tpu.memory_space<vmem>>, vector<8x128xf32>,
    return
  }
  func.func @transform_0(%arg0: i32, %arg1: memref<8xf32, #tpu.memory_space<smem>>) -> (i32, i32) {
    %c0_i32 = arith.constant 0 : i32
    %c0_i32_0 = arith.constant 0 : i32
    return %arg0, %c0_i32 : i32, i32
  }
  func.func @transform_1(%arg0: i32, %arg1: memref<8xf32, #tpu.memory_space<smem>>) -> (i32, i32) {
    %c0_i32 = arith.constant 0 : i32
    %c0_i32_0 = arith.constant 0 : i32
    return %arg0, %c0_i32 : i32, i32
  }
  func.func @transform_2(%arg0: i32, %arg1: memref<8xf32, #tpu.memory_space<smem>>) -> (i32, i32) {
    %c0_i32 = arith.constant 0 : i32
    %c0_i32_0 = arith.constant 0 : i32
    return %arg0, %c0_i32 : i32, i32
  }
}

</mosaic_0001>

<bundles_post_ra>
// kernel: tpu_custom_call.1
= control target key start
LH: loop header
LB: loop body
LE: loop exit
PB: predicated region body
PF: predicated region fallthrough
CT: control target
= control target key end

     0   :  { %s559_s15 = smov [#allocation3]   ;;  %s733_s0 = inlined_call_operand.hbm [shape: f32[8], index: 0, kind: input, shape index: {}]   ;;  %s734_s1 = inlined_call_operand.hbm [shape: f32[20,128], index: 1, kind: input, shape index: {}]   ;;  %s735_s2 = inlined_call_operand.hbm [shape: f32[20,128], index: 2, kind: output, shape index: {0}]   ;;  %s736_s3 = inlined_call_operand.hbm [shape: f32[20,128], index: 3, kind: output, shape index: {1}]  }
   0x1   :  { %s10_s14 = sshll.u32 %s733_s0, 4  ;;  %s11_s14 = int_to_ptr.hbm [resolvable:$true] %s10_s14 }
   0x2   :  { %13 = dma.hbm_to_smem %s11_s14, 16, %s559_s15, [#allocation2] }
   0x3   :  { %529 = dma.done.wait [#allocation2], 16 }
   0x4   :  { %530 = vsyncadd [#allocation2], 4294967280 }
   0x5   :  { %16 = sfence }
   0x6   :  { %17 = vsyncpa [#allocation5], 0 }
   0x7   :  { %19 = vsyncpa [#allocation5 + $0x1], 0 }
   0x8   :  { %20 = vsyncpa [#allocation6], 0 }
   0x9   :  { %22 = vsyncpa [#allocation6 + $0x1], 0 }
   0xa   :  { %23 = vsyncpa [#allocation9], 0 }
   0xb   :  { %25 = vsyncpa [#allocation9 + $0x1], 0  ;;  %s583_s16 = smov 0   ;;  %s585_s17 = smov 0  }
   0xc   :  { %s587_s18 = smov 0   ;;  %s589_s19 = smov 0  }
   0xd LB: > { %s604_s0 = sadd.s32 4294967295, %s557_s19   ;;  %s342_s20 = sadd.s32 4294967294, %s557_s19   ;;  %s557_s19 = sphi %s589_s19, %s745_s19   ;;  %s553_s18 = sphi %s587_s18, %s744_s18   ;;  %s549_s17 = sphi %s585_s17, %s743_s17   ;;  %s545_s16 = sphi %s583_s16, %s742_s16  }
   0xe   : > { %s608_s21 = sadd.s32 1, %s557_s19   ;;  %s38_s22 = sadd.s32 1, %s553_s18 }
   0xf   : > { %s35_s23 = ssub.s32 %s557_s19, %s608_s21  ;;  %p45_p0 = scmp.ne.s32.totalorder %s553_s18, %s549_s17 }
  0x10   : > { %p36_p1 = scmp.eq.s32.totalorder %s35_s23, 0  ;;  %p46_p2 = scmp.eq.s32.totalorder %s557_s19, 0 }
  0x11   : > { %p51_p3 = scmp.ne.s32.totalorder %s549_s17, %s545_s16  ;;  %p52_p4 = scmp.eq.s32.totalorder %s604_s0, 0 }
  0x12   : > { %s620_s24 = scalar_select %p36_p1, %s553_s18, %s38_s22  }
  0x13   : > { %p622_p5 = por %p46_p2, %p45_p0  ;;  %p626_p6 = por %p52_p4, %p51_p3 }
  0x14   : > { %p75_p7 = scmp.eq.s32.totalorder %s604_s0, 2  ;;  %p81_p8 = scmp.eq.s32.totalorder %s342_s20, 2 }
  0x15   : > { %p380_p9 = scmp.lt.s32.totalorder %s557_s19, 3  ;;  %s127_s29 = sand.u32 1, %s553_s18  }
  0x16   : > { %p632_p10 = por %p75_p7, %p45_p0  ;;  %p636_p11 = por %p81_p8, %p51_p3 }
  0x17   : > { %s346_s30 = sshll.u32 %s557_s19, 3  ;;  %s345_s4 = sshll.u32 %s127_s29, 3 }
  0x18   : > { %s135_s7 = scalar_lea.hbm %s734_s1, %s346_s30  ;;  %s131_s9 = scalar_lea.vmem [#allocation4], %s345_s4 }
  0x19   : > { %s137_s8 = sshll.u32 %s135_s7, 4  ;;  %s139_s10 = sshll.u32 %s131_s9, 4  ;;  %s138_s8 = int_to_ptr.hbm [resolvable:$true] %s137_s8  ;;  %s140_s10 = int_to_ptr.vmem [resolvable:$true] %s139_s10 }
  0x1a   : > { %p647_p12 = pnand %p380_p9, %p622_p5  ;;  %p347_p13 = scmp.ge.s32.totalorder %s557_s19, 1 }
  0x1b   : > { %p144_p0 = scmp.lt.s32.totalorder %s557_s19, 4  ;;  %s128_s12 = scalar_lea.sflag [#allocation5], %s127_s29 }
  0x1c   : > { %s427_s13 = sshra.s32 %s138_s8, 4  ;;  %p431_p2 = pneg %p647_p12  ;;  %s428_s13 = int_to_ptr.hbm [resolvable:$true] %s427_s13 }
  0x1d   : > { %s429_s14 = scalar_lea.hbm %s428_s13, 8  ;;  %s434_s22 = scalar_lea.hbm %s734_s1, 24 }
  0x1e   : > { %p430_p1 = scmp.ne.s32.totalorder %s428_s13, %s429_s14  ;;  %p435_p5 = scmp.lt.s32.totalorder %s428_s13, %s734_s1 }
  0x1f   : > { %p436_p7 = scmp.lt.s32.totalorder %s434_s22, %s429_s14 }
  0x20   : > { %p432_p3 = pnand %p431_p2, %p430_p1 }
  0x21   : > { %p437_p8 = por %p436_p7, %p435_p5 }
  0x22   : > { %p433_p4 = pneg %p432_p3 }
  0x24   : > { %p438_p9 = pnand %p437_p8, %p433_p4 }
  0x26   : > { %441 = shalt.err (!%p438_p9)
}
  0x27   : > { %372 = dma.hbm_to_vmem [thread:$0]  (!%p647_p12), %s138_s8, 128, %s140_s10, %s128_s12  }
  0x28   : > { %p145_p1 = pnand %p347_p13, %p144_p0 }
  0x29   : > { %s668_s29 = sand.u32 (!%p145_p1), 1, %s549_s17  }
  0x2a   : > { %148 = sbr.rel (%p145_p1) target bundleno = 81 (0x51), region = 24  ;;  %s671_s30 = sshll.u32 (!%p145_p1), %s668_s29, 3 }
  0x2b   : > { %s151_s4 = scalar_lea.sflag (!%p145_p1), [#allocation5], %s668_s29  ;;  %s154_s5 = scalar_lea.vmem (!%p145_p1), [#allocation4], %s671_s30 }
  0x2f   : > { %532 = dma.done.wait (%p626_p6), %s151_s4, 128  }
  0x30   : > { %534 = vsyncadd (%p626_p6), %s151_s4, 4294967168  ;;  %s182_s6 = sld [smem:[#allocation3]]  ;;  %s359_s12 = sshll.u32 %s604_s0, 3  ;;  %v181_v0 = vld [vmem:[%s154_s5] sm:$0xff] }
  0x31   : > { %s351_s7 = sld [smem:[#allocation3 + $0x1]]  ;;  %s220_s20 = scalar_lea.hbm %s735_s2, %s359_s12 }
  0x32   : > { %s352_s8 = sld [smem:[#allocation3 + $0x2]]  ;;  %s173_s26 = scalar_lea.vmem [#allocation7], %s671_s30 }
  0x33   : > { %s353_s9 = sld [smem:[#allocation3 + $0x3]]  ;;  %s684_s22 = sshll.u32 %s173_s26, 4  ;;  %s223_s22 = int_to_ptr.vmem [resolvable:$true] %s684_s22 }
  0x34   : > { %s354_s10 = sld [smem:[#allocation3 + $0x4]]  ;;  %s224_s25 = sshll.u32 %s220_s20, 4  ;;  %s225_s25 = int_to_ptr.hbm [resolvable:$true] %s224_s25 }
  0x35   : > { %s355_s11 = sld [smem:[#allocation3 + $0x5]]  ;;  %s234_s5 = scalar_lea.hbm %s736_s3, %s359_s12 }
  0x36   : > { %v191_v1 = vstv %s182_s6  ;;  %s356_s13 = sld [smem:[#allocation3 + $0x6]]  ;;  %s180_s14 = scalar_lea.vmem [#allocation8], %s671_s30 }
  0x37   : > { %v192_v2 = vmul.f32 %v191_v1, %v181_v0  ;;  %s691_s15 = sshll.u32 %s180_s14, 4  ;;  %s237_s15 = int_to_ptr.vmem [resolvable:$true] %s691_s15 }
  0x38   : > { %s185_s23 = sadd.f32 %s352_s8, %s351_s7  ;;  %s238_s7 = sshll.u32 %s234_s5, 4  ;;  %s239_s7 = int_to_ptr.hbm [resolvable:$true] %s238_s7 }
  0x39   : > { %v196_v3 = vstv %s353_s9  ;;  %s205_s8 = scalar_lea.sflag [#allocation6], %s668_s29  ;;  %s471_s9 = sshra.s32 %s225_s25, 4  ;;  %s472_s9 = int_to_ptr.hbm [resolvable:$true] %s471_s9 }
  0x3a   : > { %v193_v4 = vstv %s185_s23  ;;  %v197_v5 = vmul.f32 %v196_v3, %v181_v0  ;;  %v198_v6 = vstv %s354_s10  ;;  %s473_s10 = scalar_lea.hbm %s472_s9, 8  ;;  %p478_p0 = scmp.lt.s32.totalorder %s472_s9, %s735_s2 }
  0x3b   : > { %v194_v7 = vadd.f32 %v193_v4, %v192_v2  ;;  %p474_p6 = scmp.ne.s32.totalorder %s472_s9, %s473_s10 }
  0x3c   : > { %s190_s6 = sadd.f32 %s356_s13, %s355_s11  ;;  %v199_v8 = vadd.f32 %v198_v6, %v197_v5  ;;  %s477_s11 = scalar_lea.hbm %s735_s2, 24 }
  0x3d   : > { %195 = vst [vmem:[%s173_s26] sm:$0xff] %v194_v7  ;;  %p475_p12 = pnand %p474_p6, %p632_p10  ;;  %p479_p2 = scmp.lt.s32.totalorder %s477_s11, %s473_s10 }
  0x3e   : > { %v200_v9 = vmul.f32 %v199_v8, %v181_v0  ;;  %v201_v10 = vstv %s190_s6 }
  0x3f   : > { %p476_p13 = pneg %p475_p12  ;;  %p480_p3 = por %p479_p2, %p478_p0 }
  0x41   : > { %p481_p4 = pnand %p480_p3, %p476_p13 }
  0x43   : > { %484 = shalt.err (!%p481_p4)
}
  0x44   : > { %365 = dma.vmem_to_hbm [thread:$0]  (%p632_p10), %s223_s22, 128, %s225_s25, %s205_s8   ;;  %v202_v11 = vadd.f32 %v201_v10, %v200_v9 }
  0x45   : > { %s210_s26 = scalar_lea.sflag [#allocation9], %s668_s29  ;;  %s499_s23 = sshra.s32 %s239_s7, 4  ;;  %s500_s23 = int_to_ptr.hbm [resolvable:$true] %s499_s23 }
  0x46   : > { %203 = vst [vmem:[%s180_s14] sm:$0xff] %v202_v11  ;;  %s501_s0 = scalar_lea.hbm %s500_s23, 8  ;;  %s505_s6 = scalar_lea.hbm %s736_s3, 24 }
  0x47   : > { %p502_p5 = scmp.ne.s32.totalorder %s500_s23, %s501_s0  ;;  %p506_p9 = scmp.lt.s32.totalorder %s500_s23, %s736_s3 }
  0x48   : > { %p507_p1 = scmp.lt.s32.totalorder %s505_s6, %s501_s0 }
  0x49   : > { %p503_p7 = pnand %p502_p5, %p632_p10 }
  0x4a   : > { %p508_p6 = por %p507_p1, %p506_p9 }
  0x4b   : > { %p504_p8 = pneg %p503_p7 }
  0x4d   : > { %p509_p12 = pnand %p508_p6, %p504_p8 }
  0x4f   : > { %512 = shalt.err (!%p509_p12)
}
  0x50   : > { %366 = dma.vmem_to_hbm [thread:$0]  (%p632_p10), %s237_s15, 128, %s239_s7, %s210_s26  }
  0x51 PF: > { %p381_p13 = scmp.ge.s32.totalorder %s557_s19, 2  ;;  %s250_s29 = sand.u32 1, %s545_s16  }
  0x52   : > { %s251_s22 = scalar_lea.sflag [#allocation6], %s250_s29 }
  0x53   : > { %p374_p0 = pnand %p381_p13, %p636_p11 }
  0x55   : > { %p375_p2 = pneg %p374_p0 }
  0x57   : > { %536 = dma.done.wait (%p375_p2), %s251_s22, 128  }
  0x58   : > { %538 = vsyncadd (%p375_p2), %s251_s22, 4294967168  ;;  %s261_s25 = scalar_lea.sflag [#allocation9], %s250_s29 }
  0x59   : > { %540 = dma.done.wait (%p375_p2), %s261_s25, 128  }
  0x5a   : > { %542 = vsyncadd (%p375_p2), %s261_s25, 4294967168  ;;  %p28_p10 = scmp.ge.s32.totalorder %s608_s21, 5   ;;  %s742_s16 = smov %s549_s17 }
  0x5b   : > { %s743_s17 = smov %s553_s18  ;;  %s744_s18 = smov %s620_s24 }
  0x5c   : > { %s745_s19 = smov %s608_s21  ;;  %30 = sbr.rel (!%p28_p10) target bundleno = 13 (0xd), region = 86 }
  0x61   :  { %267 = vsyncpa [#allocation5], 1 }
  0x62   :  { %269 = vsyncpa [#allocation5 + $0x1], 1 }
  0x63   :  { %270 = vsyncpa [#allocation6], 1 }
  0x64   :  { %272 = vsyncpa [#allocation6 + $0x1], 1 }
  0x65   :  { %273 = vsyncpa [#allocation9], 1 }
  0x66   :  { %275 = vsyncpa [#allocation9 + $0x1], 1 }

</bundles_post_ra>
